<compile_context>
chip_gen: v5e
topology: v5e:2x2
jax: 0.10.0
libtpu: 0.0.40
codegen_flags: <defaults>
</compile_context>

<pallas_src>
import functools

import jax
import jax.numpy as jnp
from jax.experimental import pallas as pl
from jax.experimental.pallas import tpu as pltpu

STATE_SIZE = 4     # CartPole-v1 observation dim
ACTION_SIZE = 2    # CartPole-v1 action dim
HIDDEN = 64
LANE = 128         # TPU lane width


def _round_up(n, m):
    return ((n + m - 1) // m) * m


def qnetwork_kernel(x_ref, w1_ref, b1_ref, w2_ref, b2_ref, w3_ref, b3_ref, o_ref):
    x = x_ref[...]                 # [STATE_SIZE, TB]   (batch on the lane axis)
    w1 = w1_ref[...]               # [HIDDEN, STATE_SIZE]
    tb = x.shape[1]

    # ---- fc1 + ReLU: K=4 contraction unrolled as VPU broadcast FMAs ----
    acc = jnp.broadcast_to(b1_ref[...], (HIDDEN, tb))      # start from bias
    for k in range(STATE_SIZE):                            # static unroll (K=4)
        acc = acc + w1[:, k:k + 1] * x[k:k + 1, :]
    h1 = jnp.maximum(acc, 0.0)                             # [HIDDEN, TB]

    # ---- fc2 + ReLU: MXU, f32 accumulation ----
    h2 = jnp.dot(w2_ref[...], h1, preferred_element_type=jnp.float32)
    h2 = jnp.maximum(h2 + b2_ref[...], 0.0)                # [HIDDEN, TB]

    # ---- fc3 (no activation): MXU, lane-dense [ACTION_SIZE, TB] output ----
    out = jnp.dot(w3_ref[...], h2, preferred_element_type=jnp.float32)
    o_ref[...] = (out + b3_ref[...]).astype(o_ref.dtype)


@functools.partial(jax.jit, static_argnames=("batch_tile",))
def qnetwork_forward(x, params, batch_tile=1024):
    """x: [B, STATE_SIZE] float32 -> [B, ACTION_SIZE] float32."""
    w1, b1, w2, b2, w3, b3 = params
    B = x.shape[0]

    # Lane-aligned batch tile; small batches collapse to a single 128-wide tile.
    tb = max(LANE, min(batch_tile, _round_up(B, LANE)))
    b_pad = _round_up(B, tb)
    grid = (b_pad // tb,)

    # Feature-major input, zero-padded on the batch (lane) axis.  Padded
    # columns are numerically safe (zeros -> finite outputs) and sliced off.
    x_t = jnp.pad(x.astype(jnp.float32).T, ((0, 0), (0, b_pad - B)))

    const = lambda shape: pl.BlockSpec(shape, lambda i: (0, 0))

    flops = 2 * b_pad * (STATE_SIZE * HIDDEN + HIDDEN * HIDDEN + HIDDEN * ACTION_SIZE)
    weight_bytes = 4 * (w1.size + b1.size + w2.size + b2.size + w3.size + b3.size)
    cost = pl.CostEstimate(
        flops=flops,
        transcendentals=0,
        bytes_accessed=4 * b_pad * (STATE_SIZE + ACTION_SIZE) + weight_bytes,
    )

    out_t = pl.pallas_call(
        qnetwork_kernel,
        out_shape=jax.ShapeDtypeStruct((ACTION_SIZE, b_pad), jnp.float32),
        grid=grid,
        in_specs=[
            pl.BlockSpec((STATE_SIZE, tb), lambda i: (0, i)),   # x: batch-tiled
            const(w1.shape), const(b1.shape),                   # VMEM-resident
            const(w2.shape), const(b2.shape),
            const(w3.shape), const(b3.shape),
        ],
        out_specs=pl.BlockSpec((ACTION_SIZE, tb), lambda i: (0, i)),
        compiler_params=pltpu.CompilerParams(
            dimension_semantics=("parallel",),   # shard batch tiles across TCs (v7x)
        ),
        cost_estimate=cost,
    )(x_t, w1, b1, w2, b2, w3, b3)

    return out_t[:, :B].T


def init_params(key):
    """nn.Linear-style init: U(-1/sqrt(fan_in), +1/sqrt(fan_in)).
    Weights stored PyTorch-style as [out, in]; biases as [out, 1]."""
    def linear(key, fan_in, fan_out):
        kw, kb = jax.random.split(key)
        bound = 1.0 / jnp.sqrt(jnp.float32(fan_in))
        w = jax.random.uniform(kw, (fan_out, fan_in), jnp.float32, -bound, bound)
        b = jax.random.uniform(kb, (fan_out, 1), jnp.float32, -bound, bound)
        return w, b

    k1, k2, k3 = jax.random.split(key, 3)
    w1, b1 = linear(k1, STATE_SIZE, HIDDEN)
    w2, b2 = linear(k2, HIDDEN, HIDDEN)
    w3, b3 = linear(k3, HIDDEN, ACTION_SIZE)
    return (w1, b1, w2, b2, w3, b3)


def qnetwork_reference(x, params):
    """Pure-JAX reference for correctness checking."""
    w1, b1, w2, b2, w3, b3 = params
    h1 = jnp.maximum(x @ w1.T + b1.T, 0.0)
    h2 = jnp.maximum(h1 @ w2.T + b2.T, 0.0)
    return h2 @ w3.T + b3.T


if __name__ == "__main__":
    key = jax.random.PRNGKey(0)
    kp, kx = jax.random.split(key)

    params = init_params(kp)
    B = 8
    x = jax.random.normal(kx, (B, STATE_SIZE), jnp.float32)

    out = qnetwork_forward(x, params)
    out = jax.block_until_ready(out)

    ref = qnetwork_reference(x, params)
    assert out.shape == (B, ACTION_SIZE)
    assert jnp.allclose(out, ref, atol=1e-5, rtol=1e-5)

    print("KERNEL_OK")
</pallas_src>

<mosaic_0001>
module attributes {stable_mosaic.version = 11 : i64} {
  func.func @qnetwork_kernel(%arg0: i32, %arg1: memref<4x128xf32, #tpu.memory_space<vmem>>, %arg2: memref<64x4xf32, #tpu.memory_space<vmem>>, %arg3: memref<64x1xf32, #tpu.memory_space<vmem>>, %arg4: memref<64x64xf32, #tpu.memory_space<vmem>>, %arg5: memref<64x1xf32, #tpu.memory_space<vmem>>, %arg6: memref<2x64xf32, #tpu.memory_space<vmem>>, %arg7: memref<2x1xf32, #tpu.memory_space<vmem>>, %arg8: memref<2x128xf32, #tpu.memory_space<vmem>>) attributes {dimension_semantics = [#tpu.dimension_semantics<parallel>], iteration_bounds = array<i64: 1>, scalar_prefetch = 0 : i64, scratch_operands = 0 : i64, tpu.core_type = #tpu.core_type<tc>, window_params = [{transform_indices = @transform_0, window_bounds = array<i64: 4, 128>}, {pipeline_mode = #tpu.pipeline_mode<synchronous>, transform_indices = @transform_1, window_bounds = array<i64: 64, 4>}, {pipeline_mode = #tpu.pipeline_mode<synchronous>, transform_indices = @transform_2, window_bounds = array<i64: 64, 1>}, {pipeline_mode = #tpu.pipeline_mode<synchronous>, transform_indices = @transform_3, window_bounds = array<i64: 64, 64>}, {pipeline_mode = #tpu.pipeline_mode<synchronous>, transform_indices = @transform_4, window_bounds = array<i64: 64, 1>}, {pipeline_mode = #tpu.pipeline_mode<synchronous>, transform_indices = @transform_5, window_bounds = array<i64: 2, 64>}, {pipeline_mode = #tpu.pipeline_mode<synchronous>, transform_indices = @transform_6, window_bounds = array<i64: 2, 1>}, {transform_indices = @transform_7, window_bounds = array<i64: 2, 128>}]} {
    %c0 = arith.constant 0 : index
    %c0_0 = arith.constant 0 : index
    %0 = vector.load %arg1[%c0, %c0_0] : memref<4x128xf32, #tpu.memory_space<vmem>>, vector<4x128xf32>
    %c0_1 = arith.constant 0 : index
    %c0_2 = arith.constant 0 : index
    %1 = vector.load %arg2[%c0_1, %c0_2] : memref<64x4xf32, #tpu.memory_space<vmem>>, vector<64x4xf32>
    %c0_3 = arith.constant 0 : index
    %c0_4 = arith.constant 0 : index
    %2 = vector.load %arg3[%c0_3, %c0_4] : memref<64x1xf32, #tpu.memory_space<vmem>>, vector<64x1xf32>
    %3 = vector.shape_cast %2 : vector<64x1xf32> to vector<64x1xf32>
    %4 = vector.broadcast %3 : vector<64x1xf32> to vector<64x128xf32>
    %5 = vector.extract_strided_slice %1 {offsets = [0, 0], sizes = [64, 1], strides = [1, 1]} : vector<64x4xf32> to vector<64x1xf32>
    %6 = vector.extract_strided_slice %0 {offsets = [0, 0], sizes = [1, 128], strides = [1, 1]} : vector<4x128xf32> to vector<1x128xf32>
    %7 = vector.broadcast %5 : vector<64x1xf32> to vector<64x128xf32>
    %8 = vector.broadcast %6 : vector<1x128xf32> to vector<64x128xf32>
    %9 = arith.mulf %7, %8 : vector<64x128xf32>
    %10 = arith.addf %4, %9 : vector<64x128xf32>
    %11 = vector.extract_strided_slice %1 {offsets = [0, 1], sizes = [64, 1], strides = [1, 1]} : vector<64x4xf32> to vector<64x1xf32>
    %12 = vector.extract_strided_slice %0 {offsets = [1, 0], sizes = [1, 128], strides = [1, 1]} : vector<4x128xf32> to vector<1x128xf32>
    %13 = vector.broadcast %11 : vector<64x1xf32> to vector<64x128xf32>
    %14 = vector.broadcast %12 : vector<1x128xf32> to vector<64x128xf32>
    %15 = arith.mulf %13, %14 : vector<64x128xf32>
    %16 = arith.addf %10, %15 : vector<64x128xf32>
    %17 = vector.extract_strided_slice %1 {offsets = [0, 2], sizes = [64, 1], strides = [1, 1]} : vector<64x4xf32> to vector<64x1xf32>
    %18 = vector.extract_strided_slice %0 {offsets = [2, 0], sizes = [1, 128], strides = [1, 1]} : vector<4x128xf32> to vector<1x128xf32>
    %19 = vector.broadcast %17 : vector<64x1xf32> to vector<64x128xf32>
    %20 = vector.broadcast %18 : vector<1x128xf32> to vector<64x128xf32>
    %21 = arith.mulf %19, %20 : vector<64x128xf32>
    %22 = arith.addf %16, %21 : vector<64x128xf32>
    %23 = vector.extract_strided_slice %1 {offsets = [0, 3], sizes = [64, 1], strides = [1, 1]} : vector<64x4xf32> to vector<64x1xf32>
    %24 = vector.extract_strided_slice %0 {offsets = [3, 0], sizes = [1, 128], strides = [1, 1]} : vector<4x128xf32> to vector<1x128xf32>
    %25 = vector.broadcast %23 : vector<64x1xf32> to vector<64x128xf32>
    %26 = vector.broadcast %24 : vector<1x128xf32> to vector<64x128xf32>
    %27 = arith.mulf %25, %26 : vector<64x128xf32>
    %28 = arith.addf %22, %27 : vector<64x128xf32>
    %cst = arith.constant 0.000000e+00 : f32
    %29 = vector.broadcast %cst : f32 to vector<64x128xf32>
    %30 = arith.maximumf %28, %29 : vector<64x128xf32>
    %c0_5 = arith.constant 0 : index
    %c0_6 = arith.constant 0 : index
    %31 = vector.load %arg4[%c0_5, %c0_6] : memref<64x64xf32, #tpu.memory_space<vmem>>, vector<64x64xf32>
    %cst_7 = arith.constant dense<0.000000e+00> : vector<64x128xf32>
    %32 = tpu.matmul %31, %30, %cst_7 {dimension_numbers = #tpu.dot_dimension_numbers<[1], [0], [0], [1], [0, 0, 1, 1], [], []>} : vector<64x64xf32>, vector<64x128xf32>, vector<64x128xf32> -> vector<64x128xf32>
    %c0_8 = arith.constant 0 : index
    %c0_9 = arith.constant 0 : index
    %33 = vector.load %arg5[%c0_8, %c0_9] : memref<64x1xf32, #tpu.memory_space<vmem>>, vector<64x1xf32>
    %34 = vector.broadcast %33 : vector<64x1xf32> to vector<64x128xf32>
    %35 = arith.addf %32, %34 : vector<64x128xf32>
    %cst_10 = arith.constant 0.000000e+00 : f32
    %36 = vector.broadcast %cst_10 : f32 to vector<64x128xf32>
    %37 = arith.maximumf %35, %36 : vector<64x128xf32>
    %c0_11 = arith.constant 0 : index
    %c0_12 = arith.constant 0 : index
    %38 = vector.load %arg6[%c0_11, %c0_12] : memref<2x64xf32, #tpu.memory_space<vmem>>, vector<2x64xf32>
    %cst_13 = arith.constant dense<0.000000e+00> : vector<2x128xf32>
    %39 = tpu.matmul %38, %37, %cst_13 {dimension_numbers = #tpu.dot_dimension_numbers<[1], [0], [0], [1], [0, 0, 1, 1], [], []>} : vector<2x64xf32>, vector<64x128xf32>, vector<2x128xf32> -> vector<2x128xf32>
    %c0_14 = arith.constant 0 : index
    %c0_15 = arith.constant 0 : index
    %40 = vector.load %arg7[%c0_14, %c0_15] : memref<2x1xf32, #tpu.memory_space<vmem>>, vector<2x1xf32>
    %41 = vector.broadcast %40 : vector<2x1xf32> to vector<2x128xf32>
    %42 = arith.addf %39, %41 : vector<2x128xf32>
    %c0_16 = arith.constant 0 : index
    %c0_17 = arith.constant 0 : index
    %43 = vector.load %arg8[%c0_16, %c0_17] : memref<2x128xf32, #tpu.memory_space<vmem>>, vector<2x128xf32>
    tpu.vector_store %arg8[%c0_16, %c0_17], %42 {strides = array<i32>} : memref<2x128xf32, #tpu.memory_space<vmem>>, vector<2x128xf32>,
    return
  }
  func.func @transform_0(%arg0: i32) -> (i32, i32) {
    %c0_i32 = arith.constant 0 : i32
    %c0_i32_0 = arith.constant 0 : i32
    return %c0_i32, %arg0 : i32, i32
  }
  func.func @transform_1(%arg0: i32) -> (i32, i32) {
    %c0_i32 = arith.constant 0 : i32
    %c0_i32_0 = arith.constant 0 : i32
    %c0_i32_1 = arith.constant 0 : i32
    return %c0_i32, %c0_i32_0 : i32, i32
  }
  func.func @transform_2(%arg0: i32) -> (i32, i32) {
    %c0_i32 = arith.constant 0 : i32
    %c0_i32_0 = arith.constant 0 : i32
    %c0_i32_1 = arith.constant 0 : i32
    return %c0_i32, %c0_i32_0 : i32, i32
  }
  func.func @transform_3(%arg0: i32) -> (i32, i32) {
    %c0_i32 = arith.constant 0 : i32
    %c0_i32_0 = arith.constant 0 : i32
    %c0_i32_1 = arith.constant 0 : i32
    return %c0_i32, %c0_i32_0 : i32, i32
  }
  func.func @transform_4(%arg0: i32) -> (i32, i32) {
    %c0_i32 = arith.constant 0 : i32
    %c0_i32_0 = arith.constant 0 : i32
    %c0_i32_1 = arith.constant 0 : i32
    return %c0_i32, %c0_i32_0 : i32, i32
  }
  func.func @transform_5(%arg0: i32) -> (i32, i32) {
    %c0_i32 = arith.constant 0 : i32
    %c0_i32_0 = arith.constant 0 : i32
    %c0_i32_1 = arith.constant 0 : i32
    return %c0_i32, %c0_i32_0 : i32, i32
  }
  func.func @transform_6(%arg0: i32) -> (i32, i32) {
    %c0_i32 = arith.constant 0 : i32
    %c0_i32_0 = arith.constant 0 : i32
    %c0_i32_1 = arith.constant 0 : i32
    return %c0_i32, %c0_i32_0 : i32, i32
  }
  func.func @transform_7(%arg0: i32) -> (i32, i32) {
    %c0_i32 = arith.constant 0 : i32
    %c0_i32_0 = arith.constant 0 : i32
    return %c0_i32, %arg0 : i32, i32
  }
}

</mosaic_0001>

<bundles_post_ra>
// kernel: qnetwork_forward.1
= control target key start
LH: loop header
LB: loop body
LE: loop exit
PB: predicated region body
PF: predicated region fallthrough
CT: control target
= control target key end

     0   :  { %v523_v0 = vmov 1   ;;  %v524_v1 = vmov 0   ;;  %v525_v8 = vmov 2   ;;  %v526_v13 = vmov 3   ;;  %s776_s2 = inlined_call_operand.vmem [shape: f32[64,1], index: 2, kind: input, shape index: {}]   ;;  %s777_s1 = inlined_call_operand.vmem [shape: f32[64,4], index: 1, kind: input, shape index: {}]   ;;  %s778_s0 = inlined_call_operand.vmem [shape: f32[4,128], index: 0, kind: input, shape index: {}]   ;;  %s779_s4 = inlined_call_operand.vmem [shape: f32[64,1], index: 4, kind: input, shape index: {}]   ;;  %s780_s6 = inlined_call_operand.vmem [shape: f32[2,1], index: 6, kind: input, shape index: {}]   ;;  %s781_s3 = inlined_call_operand.vmem [shape: f32[64,64], index: 3, kind: input, shape index: {}]   ;;  %s782_s5 = inlined_call_operand.vmem [shape: f32[2,64], index: 5, kind: input, shape index: {}]   ;;  %s783_s7 = inlined_call_operand.vmem [shape: f32[2,128], index: 7, kind: output, shape index: {}]  }
   0x1   :  { %492 = vset.pattern.permute.xlu0 %v523_v0  ;;  %491 = vset.pattern.permute.xlu2 %v524_v1  ;;  %v41_v2 = vld [vmem:[%s776_s2 + $0x30] sm:$0xff]  ;;  %v32_v4 = vld [vmem:[%s777_s1 + $0x28] sm:$0xff]  ;;  %v34_v5 = vld [vmem:[%s777_s1 + $0x38] sm:$0xff]  ;;  %vm351_vm0 = vcmask 523264  }
   0x2   :  { %v33_v3 = vld [vmem:[%s777_s1 + $0x30] sm:$0xff]  ;;  %489 = vset.pattern.permute.xlu1 %v524_v1  ;;  %75 = vperm.xlu2 %491, %v41_v2   ;;  %v40_v6 = vld [vmem:[%s776_s2 + $0x28] sm:$0xff]  ;;  %v42_v7 = vld [vmem:[%s776_s2 + $0x38] sm:$0xff] }
   0x3   :  { %165 = vperm.xlu0 %492, %v33_v3   ;;  %115 = vperm.xlu1 %489, %v33_v3   ;;  %v594_v9 = vld [vmem:[%s777_s1 + $0x10] sm:$0xff]  ;;  %v31_v10 = vld [vmem:[%s777_s1 + $0x20] sm:$0xff]  ;;  %v605_v11 = vld [vmem:[%s777_s1 + $0x8] sm:$0xff] }
   0x4   :  { %v39_v12 = vld [vmem:[%s776_s2 + $0x20] sm:$0xff]  ;;  %v30_v14 = vld [vmem:[%s777_s1 + $0x18] sm:$0xff]  ;;  %v37_v16 = vld [vmem:[%s776_s2 + $0x10] sm:$0xff] }
   0x5   :  { %v38_v15 = vld [vmem:[%s776_s2 + $0x18] sm:$0xff]  ;;  %v27_v17 = vld [vmem:[%s777_s1] sm:$0xff]  ;;  %v36_v18 = vld [vmem:[%s776_s2 + $0x8] sm:$0xff] }
   0x6   :  { %v35_v21 = vld [vmem:[%s776_s2] sm:$0xff] }
   0x7   :  { %v26_v31 = vld [vmem:[%s778_s0] sm:$0xf] }
   0x8   :  { %v662_v32 = vperm.slane %v26_v31, 0  ;;  %v667_v37 = vperm.slane %v26_v31, 1  ;;  %v669_v39 = vperm.slane %v26_v31, 2  ;;  %v675_v44 = vperm.slane %v26_v31, 3 }
   0xa   :  { %110 = vperm.xlu2 %491, %v32_v4  }
   0xb   :  { %493 = vset.pattern.permute.xlu0 %v524_v1  ;;  %490 = vset.pattern.permute.xlu1 %v523_v0 }
   0xc   :  { %120 = vperm.xlu0 %493, %v34_v5   ;;  %169 = vperm.xlu1 %490, %v34_v5  }
  0x12   :  { %70 = vperm.xlu2 %491, %v40_v6  }
  0x14   :  { %80 = vperm.xlu0 %493, %v42_v7   ;;  %494 = vset.pattern.permute.xlu1 %v525_v8 }
  0x15   :  { %218 = vperm.xlu1 %494, %v34_v5  }
  0x1a   :  { %496 = vset.pattern.permute.xlu2 %v523_v0 }
  0x1b   :  { %161 = vperm.xlu2 %496, %v32_v4  }
  0x1c   :  { %95 = vperm.xlu0 %493, %v594_v9  }
  0x1d   :  { %495 = vset.pattern.permute.xlu1 %v524_v1 }
  0x1e   :  { %105 = vperm.xlu1 %495, %v31_v10  }
  0x23   :  { %498 = vset.pattern.permute.xlu2 %v524_v1 }
  0x24   :  { %90 = vperm.xlu0 %493, %v605_v11   ;;  %65 = vperm.xlu2 %498, %v39_v12  }
  0x26   :  { %497 = vset.pattern.permute.xlu1 %v526_v13 }
  0x27   :  { %267 = vperm.xlu1 %497, %v34_v5  }
  0x2c   :  { %509 = vset.pattern.permute.xlu0 %v526_v13  ;;  %500 = vset.pattern.permute.xlu2 %v523_v0 }
  0x2d   :  { %255 = vperm.xlu0 %509, %v31_v10   ;;  %157 = vperm.xlu2 %500, %v31_v10  }
  0x2f   :  { %499 = vset.pattern.permute.xlu1 %v524_v1 }
  0x30   :  { %100 = vperm.xlu1 %499, %v30_v14  }
  0x35   :  { %251 = vperm.xlu0 %509, %v30_v14   ;;  %502 = vset.pattern.permute.xlu2 %v524_v1 }
  0x36   :  { %60 = vperm.xlu2 %502, %v38_v15  }
  0x38   :  { %501 = vset.pattern.permute.xlu1 %v526_v13 }
  0x39   :  { %263 = vperm.xlu1 %501, %v33_v3  }
  0x3d   :  { %514 = vset.pattern.permute.xlu0 %v525_v8 }
  0x3e   :  { %214 = vperm.xlu0 %514, %v33_v3   ;;  %504 = vset.pattern.permute.xlu2 %v525_v8 }
  0x3f   :  { %206 = vperm.xlu2 %504, %v31_v10  }
  0x41   :  { %503 = vset.pattern.permute.xlu1 %v523_v0 }
  0x42   :  { %153 = vperm.xlu1 %503, %v30_v14  }
  0x46   :  { %210 = vperm.xlu0 %514, %v32_v4  }
  0x47   :  { %506 = vset.pattern.permute.xlu2 %v524_v1 }
  0x48   :  { %55 = vperm.xlu2 %506, %v37_v16  }
  0x4a   :  { %505 = vset.pattern.permute.xlu1 %v526_v13 }
  0x4b   :  { %259 = vperm.xlu1 %505, %v32_v4  }
  0x4e   :  { %194 = vperm.xlu0 %514, %v605_v11  }
  0x50   :  { %508 = vset.pattern.permute.xlu2 %v525_v8 }
  0x51   :  { %202 = vperm.xlu2 %508, %v30_v14  }
  0x53   :  { %507 = vset.pattern.permute.xlu1 %v523_v0 }
  0x54   :  { %149 = vperm.xlu1 %507, %v594_v9  }
  0x56   :  { %520 = vset.pattern.permute.xlu0 %v524_v1 }
  0x59   :  { %511 = vset.pattern.permute.xlu2 %v524_v1 }
  0x5a   :  { %85 = vperm.xlu2 %511, %v27_v17  }
  0x5c   :  { %510 = vset.pattern.permute.xlu1 %v524_v1  ;;  %v76_v19 = vpop.permute.xlu2 %75 }
  0x5d   :  { %50 = vperm.xlu1 %510, %v36_v18  }
  0x62   :  { %513 = vset.pattern.permute.xlu2 %v525_v8 }
  0x63   :  { %198 = vperm.xlu2 %513, %v594_v9  }
  0x64   :  { %v645_v20 = vpop.permute.xlu2 %110 }
  0x65   :  { %512 = vset.pattern.permute.xlu1 %v523_v0  ;;  %v129_v2 = vmul.f32 %v662_v32, %v645_v20 }
  0x66   :  { %145 = vperm.xlu1 %512, %v605_v11  }
  0x6b   :  { %516 = vset.pattern.permute.xlu2 %v523_v0 }
  0x6c   :  { %141 = vperm.xlu2 %516, %v27_v17   ;;  %v652_v22 = vpop.permute.xlu2 %70 }
  0x6e   :  { %515 = vset.pattern.permute.xlu1 %v524_v1 }
  0x6f   :  { %45 = vperm.xlu1 %515, %v35_v21  }
  0x74   :  { %518 = vset.pattern.permute.xlu2 %v525_v8 }
  0x75   :  { %v116_v23 = vpop.permute.xlu1 %115  ;;  %v166_v24 = vpop.permute.xlu0 %165  ;;  %190 = vperm.xlu2 %518, %v27_v17  }
  0x76   :  { %v162_v27 = vpop.permute.xlu2 %161  ;;  %v130_v55 = vmul.f32 %v662_v32, %v116_v23  ;;  %v179_v58 = vmul.f32 %v667_v37, %v166_v24 }
  0x77   :  { %517 = vset.pattern.permute.xlu1 %v526_v13  ;;  %v178_v12 = vmul.f32 %v667_v37, %v162_v27 }
  0x78   :  { %247 = vperm.xlu1 %517, %v594_v9   ;;  %v138_v57 = vadd.f32 %v130_v55, %v76_v19 }
  0x7a   :  { %v187_v61 = vadd.f32 %v179_v58, %v138_v57 }
  0x7d   :  { %519 = vset.pattern.permute.xlu2 %v526_v13 }
  0x7e   :  { %v121_v25 = vpop.permute.xlu0 %120  ;;  %v170_v26 = vpop.permute.xlu1 %169  ;;  %239 = vperm.xlu2 %519, %v27_v17  }
  0x7f   :  { %v66_v29 = vpop.permute.xlu2 %65  ;;  %v131_v33 = vmul.f32 %v662_v32, %v121_v25  ;;  %v180_v40 = vmul.f32 %v667_v37, %v170_v26 }
  0x80   :  { %243 = vperm.xlu1 %517, %v605_v11   ;;  %v137_v11 = vadd.f32 %v129_v2, %v652_v22 }
  0x82   :  { %v186_v20 = vadd.f32 %v178_v12, %v137_v11  ;;  %v304_v12 = vld [vmem:[%s779_s4 + $0x8] sm:$0xff] }
  0x86   :  { %v81_v28 = vpop.permute.xlu0 %80  ;;  %522 = vset.pattern.permute.xlu2 %v524_v1 }
  0x87   :  { %v219_v30 = vpop.permute.xlu1 %218  ;;  %v158_v36 = vpop.permute.xlu2 %157  ;;  %v139_v38 = vadd.f32 %v131_v33, %v81_v28 }
  0x88   :  { %521 = vset.pattern.permute.xlu1 %v524_v1  ;;  %v229_v42 = vmul.f32 %v669_v39, %v219_v30  ;;  %v177_v7 = vmul.f32 %v667_v37, %v158_v36 }
  0x89   :  { %v188_v41 = vadd.f32 %v180_v40, %v139_v38 }
  0x8b   :  { %v237_v46 = vadd.f32 %v229_v42, %v188_v41 }
  0x8e   :  { %v665_v34 = vpop.permute.xlu0 %95 }
  0x90   :  { %v106_v35 = vpop.permute.xlu1 %105  ;;  %v61_v48 = vpop.permute.xlu2 %60 }
  0x91   :  { %v128_v63 = vmul.f32 %v662_v32, %v106_v35 }
  0x93   :  { %v136_v8 = vadd.f32 %v128_v63, %v66_v29 }
  0x95   :  { %v185_v19 = vadd.f32 %v177_v7, %v136_v8 }
  0x96   :  { %v673_v43 = vpop.permute.xlu0 %90 }
  0x97   :  { %v125_v58 = vmul.f32 %v662_v32, %v673_v43 }
  0x99   :  { %v268_v45 = vpop.permute.xlu1 %267  ;;  %v207_v53 = vpop.permute.xlu2 %206 }
  0x9a   :  { %v278_v47 = vmul.f32 %v675_v44, %v268_v45  ;;  %v226_v15 = vmul.f32 %v669_v39, %v207_v53 }
  0x9c   :  { %v286_v49 = vadd.f32 %v278_v47, %v237_v46  ;;  %v234_v23 = vadd.f32 %v226_v15, %v185_v19  ;;  %v126_v46 = vmul.f32 %v662_v32, %v665_v34  ;;  %v295_v19 = vld [vmem:[%s781_s3] sm:$0xff] }
  0x9e   :  { %v294_v50 = vmax.f32 %v286_v49, 0.0 }
  0x9f   :  { %v256_v51 = vpop.permute.xlu0 %255 }
  0xa0   :  { %384 = vmatpush.msra.mxu0 %v294_v50  ;;  %469 = vmatpush.msra.mxu2 %v294_v50  ;;  %v275_v21 = vmul.f32 %v675_v44, %v256_v51  ;;  %v309_v51 = vld [vmem:[%s779_s4 + $0x30] sm:$0xff] }
  0xa1   :  { %470 = vmatpush.msra.mxu3 %v294_v50  ;;  %343 = vperm.xlu1 %521, %v309_v51  }
  0xa2   :  { %v101_v52 = vpop.permute.xlu1 %100  ;;  %v56_v59 = vpop.permute.xlu2 %55  ;;  %v283_v28 = vadd.f32 %v275_v21, %v234_v23  ;;  %v298_v21 = vld [vmem:[%s781_s3 + $0x18] sm:$0xff]  ;;  %v301_v23 = vld [vmem:[%s781_s3 + $0x30] sm:$0xff] }
  0xa3   :  { %v127_v3 = vmul.f32 %v662_v32, %v101_v52  ;;  %v134_v50 = vadd.f32 %v126_v46, %v56_v59  ;;  %v310_v52 = vld [vmem:[%s779_s4 + $0x38] sm:$0xff] }
  0xa4   :  { %v291_v33 = vmax.f32 %v283_v28, 0.0  ;;  %348 = vperm.xlu0 %520, %v310_v52  }
  0xa5   :  { %v135_v13 = vadd.f32 %v127_v3, %v61_v48  ;;  %v307_v3 = vld [vmem:[%s779_s4 + $0x20] sm:$0xff] }
  0xa7   :  { %v252_v54 = vpop.permute.xlu0 %251 }
  0xa8   :  { %v274_v24 = vmul.f32 %v675_v44, %v252_v54 }
  0xa9   :  { %333 = vperm.xlu1 %521, %v307_v3  }
  0xab   :  { %v264_v56 = vpop.permute.xlu1 %263  ;;  %v203_v9 = vpop.permute.xlu2 %202 }
  0xac   :  { %v277_v0 = vmul.f32 %v675_v44, %v264_v56  ;;  %v225_v17 = vmul.f32 %v669_v39, %v203_v9 }
  0xb0   :  { %v215_v60 = vpop.permute.xlu0 %214 }
  0xb1   :  { %v228_v62 = vmul.f32 %v669_v39, %v215_v60  ;;  %318 = vperm.xlu1 %521, %v304_v12  }
  0xb3   :  { %v236_v1 = vadd.f32 %v228_v62, %v187_v61 }
  0xb4   :  { %v154_v4 = vpop.permute.xlu1 %153  ;;  %v86_v38 = vpop.permute.xlu2 %85 }
  0xb5   :  { %v285_v5 = vadd.f32 %v277_v0, %v236_v1  ;;  %v176_v6 = vmul.f32 %v667_v37, %v154_v4  ;;  %v124_v53 = vmul.f32 %v662_v32, %v86_v38  ;;  %v305_v4 = vld [vmem:[%s779_s4 + $0x10] sm:$0xff] }
  0xb6   :  { %323 = vperm.xlu0 %520, %v305_v4  }
  0xb7   :  { %v293_v10 = vmax.f32 %v285_v5, 0.0  ;;  %v184_v16 = vadd.f32 %v176_v6, %v135_v13  ;;  %v306_v13 = vld [vmem:[%s779_s4 + $0x18] sm:$0xff] }
  0xb8   :  { %v211_v14 = vpop.permute.xlu0 %210 }
  0xb9   :  { %385 = vmatpush.msra.mxu0 %v293_v10  ;;  %471 = vmatpush.msra.mxu2 %v293_v10  ;;  %v227_v18 = vmul.f32 %v669_v39, %v211_v14  ;;  %v233_v25 = vadd.f32 %v225_v17, %v184_v16 }
  0xba   :  { %472 = vmatpush.msra.mxu3 %v293_v10 }
  0xbb   :  { %v235_v26 = vadd.f32 %v227_v18, %v186_v20  ;;  %v282_v31 = vadd.f32 %v274_v24, %v233_v25  ;;  %v300_v18 = vld [vmem:[%s781_s3 + $0x28] sm:$0xff]  ;;  %v303_v20 = vld [vmem:[%s779_s4] sm:$0xff]  ;;  %v302_v25 = vld [vmem:[%s781_s3 + $0x38] sm:$0xff] }
  0xbc   :  { %v299_v24 = vld [vmem:[%s781_s3 + $0x20] sm:$0xff] }
  0xbd   :  { %v260_v22 = vpop.permute.xlu1 %259  ;;  %v290_v36 = vmax.f32 %v282_v31, 0.0  ;;  %v199_v41 = vpop.permute.xlu2 %198 }
  0xbe   :  { %v276_v27 = vmul.f32 %v675_v44, %v260_v22  ;;  %v224_v34 = vmul.f32 %v669_v39, %v199_v41  ;;  %v296_v22 = vld [vmem:[%s781_s3 + $0x8] sm:$0xff] }
  0xc0   :  { %v284_v29 = vadd.f32 %v276_v27, %v235_v26  ;;  %v195_v62 = vpop.permute.xlu0 %194 }
  0xc1   :  { %v223_v5 = vmul.f32 %v669_v39, %v195_v62 }
  0xc2   :  { %v292_v30 = vmax.f32 %v284_v29, 0.0 }
  0xc4   :  { %386 = vmatpush.msra.mxu0 %v292_v30  ;;  %473 = vmatpush.msra.mxu2 %v292_v30 }
  0xc5   :  { %474 = vmatpush.msra.mxu3 %v292_v30 }
  0xc6   :  { %v150_v35 = vpop.permute.xlu1 %149  ;;  %387 = vmatpush.msra.mxu0 %v291_v33  ;;  %475 = vmatpush.msra.mxu2 %v291_v33  ;;  %v142_v45 = vpop.permute.xlu2 %141 }
  0xc7   :  { %476 = vmatpush.msra.mxu3 %v291_v33  ;;  %v175_v48 = vmul.f32 %v667_v37, %v150_v35  ;;  %v173_v55 = vmul.f32 %v667_v37, %v142_v45 }
  0xc8   :  { %388 = vmatpush.msra.mxu0 %v290_v36  ;;  %477 = vmatpush.msra.mxu2 %v290_v36 }
  0xc9   :  { %478 = vmatpush.msra.mxu3 %v290_v36  ;;  %v183_v54 = vadd.f32 %v175_v48, %v134_v50 }
  0xcb   :  { %v232_v59 = vadd.f32 %v224_v34, %v183_v54 }
  0xcf   :  { %v51_v40 = vpop.permute.xlu1 %50  ;;  %v191_v49 = vpop.permute.xlu2 %190 }
  0xd0   :  { %v133_v63 = vadd.f32 %v125_v58, %v51_v40  ;;  %v222_v0 = vmul.f32 %v669_v39, %v191_v49  ;;  %v426_v39 = vld [vmem:[%s780_s6] sm:$0x3] }
  0xd1   :  { %429 = vperm.xlu0 %520, %v426_v39  }
  0xd8   :  { %v146_v42 = vpop.permute.xlu1 %145  ;;  %v240_v32 = vpop.permute.xlu2 %239 }
  0xd9   :  { %v174_v60 = vmul.f32 %v667_v37, %v146_v42  ;;  %v308_v37 = vld [vmem:[%s779_s4 + $0x28] sm:$0xff]  ;;  %v271_v8 = vmul.f32 %v675_v44, %v240_v32 }
  0xda   :  { %338 = vperm.xlu2 %522, %v308_v37  }
  0xdb   :  { %v182_v43 = vadd.f32 %v174_v60, %v133_v63  ;;  %v425_v63 = vld [vmem:[%s782_s5] sm:$0x3] }
  0xdd   :  { %v231_v10 = vadd.f32 %v223_v5, %v182_v43 }
  0xe1   :  { %v46_v47 = vpop.permute.xlu1 %45 }
  0xe2   :  { %v132_v56 = vadd.f32 %v124_v53, %v46_v47  ;;  %328 = vperm.xlu2 %522, %v306_v13  }
  0xe4   :  { %v181_v1 = vadd.f32 %v173_v55, %v132_v56 }
  0xe6   :  { %v230_v7 = vadd.f32 %v222_v0, %v181_v1 }
  0xe8   :  { %v279_v14 = vadd.f32 %v271_v8, %v230_v7 }
  0xea   :  { %v248_v57 = vpop.permute.xlu1 %247  ;;  %v287_v17 = vmax.f32 %v279_v14, 0.0  ;;  %313 = vperm.xlu2 %522, %v303_v20  }
  0xeb   :  { %v273_v61 = vmul.f32 %v675_v44, %v248_v57 }
  0xed   :  { %v281_v2 = vadd.f32 %v273_v61, %v232_v59 }
  0xef   :  { %v289_v6 = vmax.f32 %v281_v2, 0.0 }
  0xf1   :  { %389 = vmatpush.msra.mxu0 %v289_v6  ;;  %479 = vmatpush.msra.mxu2 %v289_v6 }
  0xf2   :  { %480 = vmatpush.msra.mxu3 %v289_v6  ;;  %v244_v9 = vpop.permute.xlu1 %243 }
  0xf3   :  { %v272_v11 = vmul.f32 %v675_v44, %v244_v9  ;;  %v297_v44 = vld [vmem:[%s781_s3 + $0x10] sm:$0xff] }
  0xf5   :  { %v280_v15 = vadd.f32 %v272_v11, %v231_v10 }
  0xf7   :  { %v288_v16 = vmax.f32 %v280_v15, 0.0 }
  0xf9   :  { %390 = vmatpush.msra.mxu0 %v288_v16  ;;  %481 = vmatpush.msra.mxu2 %v288_v16 }
  0xfa   :  { %482 = vmatpush.msra.mxu3 %v288_v16 }
  0xfb   :  { %391 = vmatpush.msra.mxu0 %v287_v17  ;;  %483 = vmatpush.msra.mxu2 %v287_v17 }
  0xfc   :  { %484 = vmatpush.msra.mxu3 %v287_v17  ;;  %462 = vmatmul.msk.f32.vlgmr.msra.gmra.mxu2 %vm351_vm0, %v297_v44 }
  0xfd   :  { %465 = vmatmul.msk.f32.vlgmr.msra.gmra.mxu3 %vm351_vm0, %v300_v18  ;;  %460 = vmatmul.msk.f32.vlgmr.msra.gmra.mxu0 %vm351_vm0, %v295_v19 }
 0x104   :  { %463 = vmatmul.msk.f32.gmra.mxu2 %vm351_vm0, %v298_v21 }
 0x105   :  { %466 = vmatmul.msk.f32.gmra.mxu3 %vm351_vm0, %v301_v23  ;;  %461 = vmatmul.msk.f32.gmra.mxu0 %vm351_vm0, %v296_v22 }
 0x10c   :  { %464 = vmatmul.msk.f32.gmra.mxu2 %vm351_vm0, %v299_v24 }
 0x10d   :  { %467 = vmatmul.msk.f32.gmra.mxu3 %vm351_vm0, %v302_v25 }
 0x113   :  { %v344_v28 = vpop.permute.xlu1 %343 }
 0x116   :  { %v349_v33 = vpop.permute.xlu0 %348 }
 0x11b   :  { %v334_v35 = vpop.permute.xlu1 %333 }
 0x123   :  { %v319_v53 = vpop.permute.xlu1 %318 }
 0x128   :  { %v324_v50 = vpop.permute.xlu0 %323 }
 0x134   :  { %v339_v29 = vpop.permute.xlu2 %338 }
 0x13c   :  { %v329_v38 = vpop.permute.xlu2 %328 }
 0x143   :  { %v430_v0 = vpop.permute.xlu0 %429 }
 0x144   :  { %v314_v56 = vpop.permute.xlu2 %313 }
 0x17a   :  { %v393_v36 = vpop.f32.mrf.mxu0 }
 0x17b   :  { %v394_v60 = vadd.f32 %v393_v36, %v314_v56 }
 0x17d   :  { %v417_v62 = vmax.f32 %v394_v60, 0.0 }
 0x17f   :  { %v399_v26 = vpop.f32.mrf.mxu2 }
 0x180   :  { %v408_v27 = vpop.f32.mrf.mxu3  ;;  %v400_v34 = vadd.f32 %v399_v26, %v324_v50 }
 0x181   :  { %v409_v46 = vadd.f32 %v408_v27, %v339_v29 }
 0x182   :  { %v396_v54 = vpop.f32.mrf.mxu0  ;;  %v419_v59 = vmax.f32 %v400_v34, 0.0 }
 0x183   :  { %v422_v51 = vmax.f32 %v409_v46, 0.0  ;;  %v397_v58 = vadd.f32 %v396_v54, %v319_v53 }
 0x185   :  { %v418_v61 = vmax.f32 %v397_v58, 0.0 }
 0x187   :  { %v402_v30 = vpop.f32.mrf.mxu2 }
 0x188   :  { %v411_v31 = vpop.f32.mrf.mxu3  ;;  %v403_v52 = vadd.f32 %v402_v30, %v329_v38 }
 0x189   :  { %v412_v41 = vadd.f32 %v411_v31, %v344_v28 }
 0x18a   :  { %v420_v57 = vmax.f32 %v403_v52, 0.0 }
 0x18b   :  { %v423_v48 = vmax.f32 %v412_v41, 0.0 }
 0x18f   :  { %v405_v45 = vpop.f32.mrf.mxu2 }
 0x190   :  { %v414_v40 = vpop.f32.mrf.mxu3  ;;  %v406_v49 = vadd.f32 %v405_v45, %v334_v35 }
 0x191   :  { %v415_v42 = vadd.f32 %v414_v40, %v349_v33 }
 0x192   :  { %v421_v55 = vmax.f32 %v406_v49, 0.0 }
 0x193   :  { %v424_v47 = vmax.f32 %v415_v42, 0.0 }
 0x195   :  { %443 = vmatpush.msra.mxu1 %v424_v47 }
 0x197   :  { %444 = vmatpush.msra.mxu1 %v423_v48 }
 0x199   :  { %445 = vmatpush.msra.mxu1 %v422_v51 }
 0x19b   :  { %446 = vmatpush.msra.mxu1 %v421_v55 }
 0x19d   :  { %447 = vmatpush.msra.mxu1 %v420_v57 }
 0x19f   :  { %448 = vmatpush.msra.mxu1 %v419_v59 }
 0x1a1   :  { %449 = vmatpush.msra.mxu1 %v418_v61 }
 0x1a3   :  { %450 = vmatpush.msra.mxu1 %v417_v62 }
 0x1a4   :  { %468 = vmatmul.msk.f32.vlgmr.msra.gmra.mxu1 %vm351_vm0, %v425_v63 }
 0x221   :  { %v452_v1 = vpop.f32.mrf.mxu1 }
 0x222   :  { %v453_v2 = vadd.f32 %v452_v1, %v430_v0 }
 0x224   :  { %455 = vst [vmem:[%s783_s7] sm:$0x3] %v453_v2 }

</bundles_post_ra>
